<compile_context>
chip_gen: v7x
topology: tpu7x:2x2x1
jax: 0.10.0
libtpu: 0.0.40
codegen_flags: <defaults>
</compile_context>

<pallas_src>
import math

import jax
import jax.numpy as jnp
from jax.experimental import pallas as pl
from jax.experimental.pallas import tpu as pltpu


_TARGET_BLOCK_BYTES = 1 << 20       # ~1 MiB blocks: ~85% of HBM roofline in the
                                    # measured tile-size sweep, tiny per-step cost.
_DEFAULT_SCOPED_VMEM = 16 << 20     # smallest per-generation scoped-VMEM default.


def _merge_adjacent_axes(shape, order):
    """Collapse runs of input axes that stay adjacent and in-order in the
    output.  Returns (merged_input_shape, merged_order); the reshapes on both
    ends are contiguous collapses (free in XLA)."""
    groups = []                       # groups of input axes, in OUTPUT order
    for a in order:
        if groups and a == groups[-1][-1] + 1:
            groups[-1].append(a)
        else:
            groups.append([a])
    order_of_groups = sorted(range(len(groups)), key=lambda gi: groups[gi][0])
    new_axis = {gi: k for k, gi in enumerate(order_of_groups)}
    merged_shape = tuple(
        int(math.prod(shape[a] for a in groups[gi])) for gi in order_of_groups)
    merged_order = tuple(new_axis[gi] for gi in range(len(groups)))
    return merged_shape, merged_order


def _vmem_capacity_bytes():
    try:
        return int(pltpu.get_tpu_info().vmem_capacity_bytes)
    except Exception:
        return 64 << 20               # v7x physical VMEM (smallest generation).


def _working_set_budget_bytes():
    """Cap on the double-buffered working set 2 x (in_block + out_block):
    ~28 MiB on v7x (64 MiB VMEM), ~56 MiB on v5e/v6e (128 MiB VMEM)."""
    cap = _vmem_capacity_bytes()
    return max(8 << 20, min(int(cap * 0.45), 56 << 20))


def _vmem_limit(working_set_bytes):
    need = int(working_set_bytes) + (2 << 20)        # + headroom
    if need <= _DEFAULT_SCOPED_VMEM:
        return None                                  # leave the default alone
    return int(min(need, int(_vmem_capacity_bytes() * 0.9)))


def _compiler_params(dim_sem, vmem_limit):
    kwargs = {"dimension_semantics": dim_sem}
    if vmem_limit is not None:
        kwargs["vmem_limit_bytes"] = vmem_limit
    return pltpu.CompilerParams(**kwargs)


def _cost(x):
    nbytes = int(x.size) * x.dtype.itemsize
    return pl.CostEstimate(flops=0, transcendentals=0, bytes_accessed=2 * nbytes)


def _largest_divisor(n, cap):
    """Largest divisor of n that is <= cap (>= 1)."""
    n = int(n)
    cap = max(1, min(int(cap), n))
    best, i = 1, 1
    while i * i <= n:
        if n % i == 0:
            if i <= cap and i > best:
                best = i
            j = n // i
            if j <= cap and j > best:
                best = j
        i += 1
    return best


def _aligned_divisor(n, mult, cap):
    """Largest divisor of n that is a multiple of `mult` and <= cap.
    Falls back to `mult` (smallest legal sub-tile) and to n (full dim, always
    BlockSpec-legal) when n is not divisible by `mult`."""
    n = int(n)
    if n % mult != 0:
        return n
    best, i = None, 1
    while i * i <= n:
        if n % i == 0:
            for d in (i, n // i):
                if d % mult == 0 and d <= cap and (best is None or d > best):
                    best = d
        i += 1
    return best if best is not None else mult


def _permute_dma_relayout(x, ms, mo, out_shape):
    """order keeps the original last two (sublane, lane) axes: the permutation
    is expressed purely through BlockSpec index_maps and the kernel body is a
    copy (zero XLU work, full-dim lane-dense stores)."""
    n = len(ms)
    itemsize = x.dtype.itemsize
    # After maximal merging only the LAST merged axis is guaranteed fixed; split
    # its trailing group into (rest, original minor dim) so the view's last two
    # axes are both kept -> full-dim (constraint-compliant) trailing blocks.
    minor = int(x.shape[-1])
    view_shape = ms[:-1] + (ms[-1] // minor, minor)
    view_order = mo[:-1] + (n - 1, n)
    nv = len(view_shape)
    lead = nv - 2
    v_out = tuple(view_shape[a] for a in view_order)
    inv = tuple(view_order.index(a) for a in range(nv))
    S2, S1 = view_shape[-2], view_shape[-1]

    budget = _working_set_budget_bytes()
    hard_elems = max(1, (budget // 4) // itemsize)
    target_elems = max(1, min(_TARGET_BLOCK_BYTES, budget // 4) // itemsize)
    sub_mult = 8 * max(1, 4 // itemsize)          # packed dtypes need 16/32 sublanes

    # Tile the kept trailing slab only if it alone exceeds the VMEM budget.
    t1, t2 = S1, S2
    if S2 * t1 > hard_elems:
        t1 = _aligned_divisor(S1, 128, max(128, hard_elems // max(S2, 1)))
    if S2 * t1 > hard_elems:
        t2 = _aligned_divisor(S2, sub_mult, max(sub_mult, hard_elems // max(t1, 1)))
    slab = t1 * t2

    # Grow ONE leading output axis toward ~1 MiB blocks (per-step overhead
    # ~0.35us no longer dominates) while keeping >= 2 grid steps in total
    # (pipelining; feeds both v7x TensorCores).
    grow_p, B = lead - 1, 1
    for p in range(lead):
        size = v_out[p]
        others = (S2 // t2) * (S1 // t1)
        for q in range(lead):
            if q != p:
                others *= v_out[q]
        bmax = max(1, target_elems // max(slab, 1))
        if others <= 1:
            bmax = min(bmax, max(1, size // 2))
        cand = _largest_divisor(size, bmax)
        if cand >= B:
            B, grow_p = cand, p
    ax_in = view_order[grow_p]

    grid = tuple(v_out[p] // B if p == grow_p else v_out[p] for p in range(lead))
    grid = grid + (S2 // t2, S1 // t1)
    in_block = tuple(B if a == ax_in else pl.Squeezed()
                     for a in range(lead)) + (t2, t1)
    out_block = tuple(B if p == grow_p else pl.Squeezed()
                      for p in range(lead)) + (t2, t1)

    def in_map(*g):
        return tuple(g[inv[a]] for a in range(lead)) + (g[lead], g[lead + 1])

    def out_map(*g):
        return tuple(g)

    def kernel(x_ref, o_ref):
        o_ref[...] = x_ref[...]                 # pure DMA relayout
    # TODO(synk): if a profile still shows exposed DMA on this copy kernel, try
    # pipeline_mode=pl.Buffered(3) on the input spec (v6e) or an HBM->HBM
    # make_async_copy variant with memory_space=pl.ANY (v7x).

    working = 4 * B * slab * itemsize           # 2 buffers x (in + out block)
    y = pl.pallas_call(
        kernel,
        out_shape=jax.ShapeDtypeStruct(v_out, x.dtype),
        grid=grid,
        in_specs=[pl.BlockSpec(in_block, in_map)],
        out_specs=pl.BlockSpec(out_block, out_map),
        # Every output block is written exactly once -> all grid axes parallel.
        compiler_params=_compiler_params(("parallel",) * len(grid),
                                         _vmem_limit(working)),
        cost_estimate=_cost(x),
    )(x.reshape(view_shape))
    return y.reshape(out_shape)


def _permute_batched_swap(x, ms, mo, out_shape):
    """Merged order is (0, .., k-1, n-1, n-2): a batched swap of the last two
    merged axes (covers NCHW<->NHWC and plain 2-D transposes).  Batch dims are
    squeezed so the kernel performs a pure 2-D tile transpose; the swapped dims
    are tiled in 128-multiples toward ~1 MiB blocks, capped by the VMEM budget."""
    n = len(ms)
    k = n - 2
    P, Q = ms[-2], ms[-1]                       # input (sublane, lane) dims
    itemsize = x.dtype.itemsize
    budget = _working_set_budget_bytes()
    hard_elems = max(1, (budget // 4) // itemsize)
    target_elems = max(1, min(_TARGET_BLOCK_BYTES, budget // 4) // itemsize)

    # Keep the output lane dim (tP) as large as possible (lane-dense stores are
    # the biggest single lever); shrink Q first, then P, then enforce the hard
    # VMEM cap.  Non-128-divisible dims stay full (always BlockSpec-legal).
    tP, tQ = P, Q
    if tP * tQ > target_elems:
        tQ = _aligned_divisor(Q, 128, max(128, target_elems // max(tP, 1)))
    if tP * tQ > target_elems:
        tP = _aligned_divisor(P, 128, max(128, target_elems // max(tQ, 1)))
    if tP * tQ > hard_elems:
        tQ = _aligned_divisor(Q, 128, max(128, hard_elems // max(tP, 1)))
    if tP * tQ > hard_elems:
        # TODO(synk): if both dims are large and not 128-divisible the tile is
        # forced to the full matrix; a padded-tile variant would bound VMEM.
        tP = _aligned_divisor(P, 128, max(128, hard_elems // max(tQ, 1)))

    m_out = tuple(ms[:k]) + (Q, P)
    grid = tuple(ms[:k]) + (Q // tQ, P // tP)
    in_block = (pl.Squeezed(),) * k + (tP, tQ)
    out_block = (pl.Squeezed(),) * k + (tQ, tP)

    def in_map(*g):
        return tuple(g[:k]) + (g[k + 1], g[k])

    def out_map(*g):
        return tuple(g)

    def kernel(x_ref, o_ref):
        # TODO(synk): when the new minor axis (tP) is < 128 (NCHW->NHWC with few
        # channels) stores are masked vst; assembling lane-dense 128-wide rows
        # (pltpu.roll/select or pltpu.bitcast packing) would remove that.
        o_ref[...] = x_ref[...].T

    working = 4 * tP * tQ * itemsize
    y = pl.pallas_call(
        kernel,
        out_shape=jax.ShapeDtypeStruct(m_out, x.dtype),
        grid=grid,
        in_specs=[pl.BlockSpec(in_block, in_map)],
        out_specs=pl.BlockSpec(out_block, out_map),
        compiler_params=_compiler_params(("parallel",) * len(grid),
                                         _vmem_limit(working)),
        cost_estimate=_cost(x),
    )(x.reshape(ms))
    return y.reshape(out_shape)


def _permute_single_step(x, ms, mo, out_shape):
    """Rare exotic permutations (lane/sublane axes move to non-adjacent output
    positions): one fused grid step over the axis-merged array."""
    n = len(ms)
    m_out = tuple(ms[a] for a in mo)

    def kernel(x_ref, o_ref):
        o_ref[...] = jnp.transpose(x_ref[...], mo)

    # TODO(synk): very large exotic permutations would need a multi-pass
    # decomposition into batched 2-D swaps; this path is best-effort (raises the
    # VMEM limit but cannot shrink the whole-array block).
    working = 4 * int(x.size) * x.dtype.itemsize
    y = pl.pallas_call(
        kernel,
        out_shape=jax.ShapeDtypeStruct(m_out, x.dtype),
        grid=(1,),
        in_specs=[pl.BlockSpec(ms, lambda i: (0,) * n)],
        out_specs=pl.BlockSpec(m_out, lambda i: (0,) * n),
        compiler_params=_compiler_params(("arbitrary",), _vmem_limit(working)),
        cost_estimate=_cost(x),
    )(x.reshape(ms))
    return y.reshape(out_shape)


def permute_pallas(x, order):
    """Pallas equivalent of torch.Tensor.permute(*order)."""
    order = tuple(int(o) for o in order)
    ndim = x.ndim
    assert sorted(order) == list(range(ndim)), "order must be a permutation"
    if order == tuple(range(ndim)):
        return x                                   # identity permutation
    out_shape = tuple(x.shape[i] for i in order)
    ms, mo = _merge_adjacent_axes(x.shape, order)
    n = len(ms)

    # Last two input axes untouched: pure DMA relayout, no in-kernel transpose.
    if order[-2:] == (ndim - 2, ndim - 1):
        return _permute_dma_relayout(x, ms, mo, out_shape)

    # Merged order is a batched swap of the last two merged axes.
    if mo == tuple(range(n - 2)) + (n - 1, n - 2):
        return _permute_batched_swap(x, ms, mo, out_shape)

    # Exotic fallback.
    return _permute_single_step(x, ms, mo, out_shape)


class Permute:
    """Mirror of the PyTorch nn.Module: Permute(*order)(x) == x.permute(*order)."""

    def __init__(self, *order):
        self.order = tuple(order)

    def __call__(self, x):
        return permute_pallas(x, self.order)


if __name__ == "__main__":
    key = jax.random.PRNGKey(0)
    k1, k2, k3, k4 = jax.random.split(key, 4)

    # 1) Module demo: NCHW -> NHWC at the module's natural small shape.
    x = jax.random.normal(k1, (2, 4, 16, 16), dtype=jnp.float32)
    mod = Permute(0, 2, 3, 1)
    out = jax.block_until_ready(mod(x))
    ref = jnp.transpose(x, (0, 2, 3, 1))
    assert out.shape == ref.shape, (out.shape, ref.shape)
    assert out.dtype == ref.dtype, (out.dtype, ref.dtype)
    assert jnp.array_equal(out, ref), "Pallas permute mismatch (NCHW->NHWC)"

    # 2) Permutation keeping the last two axes: grown-block DMA relayout path.
    x2 = jax.random.normal(k2, (8, 16, 64, 128), dtype=jnp.float32)
    assert jnp.array_equal(permute_pallas(x2, (1, 0, 2, 3)),
                           jnp.transpose(x2, (1, 0, 2, 3)))

    # 3) Larger NCHW -> NHWC and NHWC -> NCHW: tiled batched-swap path.
    x3 = jax.random.normal(k3, (4, 16, 64, 128), dtype=jnp.float32)
    assert jnp.array_equal(permute_pallas(x3, (0, 2, 3, 1)),
                           jnp.transpose(x3, (0, 2, 3, 1)))
    assert jnp.array_equal(permute_pallas(x3, (0, 3, 1, 2)),
                           jnp.transpose(x3, (0, 3, 1, 2)))

    # 4) Plain 2-D transpose: tiled over both axes (128-multiple tiles).
    x4 = jax.random.normal(k4, (512, 1024), dtype=jnp.float32)
    assert jnp.array_equal(permute_pallas(x4, (1, 0)), jnp.transpose(x4))

    print("KERNEL_OK")
</pallas_src>

<mosaic_0001>
module attributes {stable_mosaic.version = 11 : i64} {
  func.func @kernel(%arg0: i32, %arg1: i32, %arg2: i32, %arg3: memref<1x4x256xf32, #tpu.memory_space<vmem>>, %arg4: memref<1x256x4xf32, #tpu.memory_space<vmem>>) attributes {dimension_semantics = [#tpu.dimension_semantics<parallel>, #tpu.dimension_semantics<parallel>, #tpu.dimension_semantics<parallel>], iteration_bounds = array<i64: 2, 1, 1>, scalar_prefetch = 0 : i64, scratch_operands = 0 : i64, tpu.core_type = #tpu.core_type<tc>, window_params = [{transform_indices = @transform_0, window_bounds = array<i64: 1, 4, 256>}, {transform_indices = @transform_1, window_bounds = array<i64: 1, 256, 4>}]} {
    %c0 = arith.constant 0 : index
    %c0_0 = arith.constant 0 : index
    %c0_1 = arith.constant 0 : index
    %0 = vector.load %arg3[%c0, %c0_0, %c0_1] : memref<1x4x256xf32, #tpu.memory_space<vmem>>, vector<1x4x256xf32>
    %1 = vector.shape_cast %0 : vector<1x4x256xf32> to vector<4x256xf32>
    %2 = tpu.transpose %1, [1, 0] : vector<4x256xf32> -> vector<256x4xf32>
    %c0_2 = arith.constant 0 : index
    %c0_3 = arith.constant 0 : index
    %c0_4 = arith.constant 0 : index
    %3 = vector.load %arg4[%c0_2, %c0_3, %c0_4] : memref<1x256x4xf32, #tpu.memory_space<vmem>>, vector<1x256x4xf32>
    %4 = vector.shape_cast %3 : vector<1x256x4xf32> to vector<256x4xf32>
    %5 = vector.shape_cast %2 : vector<256x4xf32> to vector<1x256x4xf32>
    tpu.vector_store %arg4[%c0_2, %c0_3, %c0_4], %5 {strides = array<i32>} : memref<1x256x4xf32, #tpu.memory_space<vmem>>, vector<1x256x4xf32>,
    return
  }
  func.func @transform_0(%arg0: i32, %arg1: i32, %arg2: i32) -> (i32, i32, i32) {
    %c0_i32 = arith.constant 0 : i32
    return %arg0, %arg2, %arg1 : i32, i32, i32
  }
  func.func @transform_1(%arg0: i32, %arg1: i32, %arg2: i32) -> (i32, i32, i32) {
    %c0_i32 = arith.constant 0 : i32
    return %arg0, %arg1, %arg2 : i32, i32, i32
  }
}

</mosaic_0001>

<bundles_post_ra>
// kernel: tpu_custom_call.1
= control target key start
LH: loop header
LB: loop body
LE: loop exit
PB: predicated region body
PF: predicated region fallthrough
CT: control target
= control target key end

     0   :  { %6 = vsyncpa [#allocation3], 0  ;;  %s749_s0 = inlined_call_operand.hbm [shape: f32[2,4,256], index: 0, kind: input, shape index: {}]   ;;  %s750_s1 = inlined_call_operand.vmem [shape: f32[2,256,4], index: 1, kind: output, shape index: {}]  }
   0x1   :  { %8 = vsyncpa [#allocation3 + $0x1], 0  ;;  %s558_s6 = smov 0   ;;  %s560_s7 = smov 0  }
   0x2   :  { %s562_s8 = smov 0   ;;  %s564_s9 = smov 0  }
   0x3   :  { %s566_s10 = smov 0   ;;  %s568_s11 = smov 0  }
   0x4 LB: > { %s393_s12 = sadd.s32 4294967295, %s545_s11   ;;  %s33_s13 = sadd.s32 1, %s541_s10  ;;  %s545_s11 = sphi %s568_s11, %s14_s11   ;;  %s541_s10 = sphi %s566_s10, %s760_s10   ;;  %s537_s9 = sphi %s564_s9, %s759_s9   ;;  %s533_s8 = sphi %s562_s8, %s758_s8   ;;  %s529_s7 = sphi %s560_s7, %s757_s7   ;;  %s525_s6 = sphi %s558_s6, %s756_s6  }
   0x5   : > { %p35_p0 = scmp.ge.s32.totalorder %s33_s13, 2  ;;  %s44_s14 = sadd.s32 1, %s533_s8 }
   0x6   : > { %p51_p1 = scmp.ne.s32.totalorder %s533_s8, %s529_s7  ;;  %p52_p2 = scmp.eq.s32.totalorder %s545_s11, 0 }
   0x7   : > { %s762_s13 = smov (%p35_p0, %s33_s13), 0  ;;  %p57_p4 = scmp.ne.s32.totalorder %s529_s7, %s525_s6 }
   0x8   : > { %p594_p3 = por %p52_p2, %p51_p1  ;;  %s37_s16 = ssub.s32 %s541_s10, %s762_s13 }
   0x9   : > { %p58_p5 = scmp.eq.s32.totalorder %s393_s12, 0  ;;  %p42_p6 = scmp.eq.s32.totalorder %s37_s16, 0 }
   0xa   : > { %p414_p8 = scmp.lt.s32.totalorder %s545_s11, 2  ;;  %s111_s19 = sand.u32 1, %s533_s8  }
   0xb   : > { %p601_p7 = por %p58_p5, %p57_p4  ;;  %s406_s20 = sshll.u32 %s541_s10, 7 }
   0xc   : > { %s607_s18 = scalar_select %p42_p6, %s533_s8, %s44_s14  }
   0xd   : > { %s397_s21 = sshll.u32 %s111_s19, 3  ;;  %s614_s24 = scalar_lea.hbm %s749_s0, %s406_s20 }
   0xe   : > { %s115_s25 = scalar_lea.vmem [#allocation2], %s397_s21  ;;  %p618_p9 = pnand %p414_p8, %p594_p3 }
   0xf   : > { %s127_s26 = sshll.u32 %s115_s25, 4  ;;  %s112_s28 = scalar_lea.sflag [#allocation3], %s111_s19  ;;  %s622_s26 = int_to_ptr.vmem [resolvable:$true] %s127_s26 }
  0x10   : > { %s465_s29 = scalar_lea.hbm %s614_s24, 128  ;;  %p467_p13 = pneg %p618_p9 }
  0x11   : > { %p466_p12 = scmp.ne.s32.totalorder %s614_s24, %s465_s29  ;;  %s470_s3 = scalar_lea.hbm %s749_s0, 256 }
  0x12   : > { %p471_p2 = scmp.lt.u32.totalorder %s614_s24, %s749_s0  ;;  %p472_p3 = scmp.lt.u32.totalorder %s470_s3, %s465_s29 }
  0x13   : > { %p468_p0 = pnand %p467_p13, %p466_p12  ;;  %p474_p5 = scmp.lt.u32.totalorder %s465_s29, %s614_s24 }
  0x14   : > { %p473_p4 = por %p472_p3, %p471_p2 }
  0x15   : > { %p469_p1 = pneg %p468_p0 }
  0x16   : > { %p475_p6 = por %p474_p5, %p473_p4 }
  0x18   : > { %p476_p8 = pnand %p475_p6, %p469_p1 }
  0x1a   : > { %479 = shalt.err (!%p476_p8)
}
  0x1b   : > { %s480_s6 = scalar_lea.vmem %s622_s26, 128  ;;  %s547_s12 = smov [#allocation2]  }
  0x1c   : > { %p481_p12 = scmp.ne.s32.totalorder %s622_s26, %s480_s6  ;;  %s485_s14 = sshll.u32 %s547_s12, 4  ;;  %s486_s14 = int_to_ptr.vmem [resolvable:$false] %s485_s14 }
  0x1d   : > { %s487_s15 = scalar_lea.vmem %s486_s14, 256  ;;  %p488_p11 = scmp.lt.s32.totalorder %s622_s26, %s486_s14 }
  0x1e   : > { %p483_p0 = pnand %p481_p12, %p467_p13  ;;  %p489_p2 = scmp.lt.s32.totalorder %s487_s15, %s480_s6 }
  0x20   : > { %p484_p10 = pneg %p483_p0  ;;  %p490_p3 = por %p489_p2, %p488_p11 }
  0x22   : > { %p491_p4 = pnand %p490_p3, %p484_p10 }
  0x24   : > { %494 = shalt.err (!%p491_p4)
}
  0x25   : > { %413 = dma.hbm_to_vmem [thread:$0]  (!%p618_p9), %s614_s24, 128, %s622_s26, %s112_s28  }
  0x26   : > { %p754_p1 = scmp.lt.s32.totalorder %s545_s11, 3  ;;  %p755_p5 = scmp.ge.s32.totalorder %s545_s11, 1 }
  0x28   : > { %p133_p13 = pnand %p755_p5, %p754_p1 }
  0x29   : > { %s138_s16 = sand.u32 (!%p133_p13), 1, %s529_s7  }
  0x2a   : > { %136 = sbr.rel (%p133_p13) target bundleno = 305 (0x131), region = 24  ;;  %s401_s19 = sshll.u32 (!%p133_p13), %s138_s16, 3 }
  0x2b   : > { %s139_s20 = scalar_lea.sflag (!%p133_p13), [#allocation3], %s138_s16  ;;  %s142_s21 = scalar_lea.vmem (!%p133_p13), [#allocation2], %s401_s19 }
  0x31   : > { %520 = dma.done.wait (%p601_p7), %s139_s20, 128  }
  0x32   : > { %522 = vsyncadd (%p601_p7), %s139_s20, 4294967168  ;;  %v182_v0 = vld [vmem:[%s142_s21] sm:$0xff]  ;;  %p170_p9 = scmp.lt.s32.totalorder %s537_s9, 1  ;;  %vm250_vm0 = vcmask 31744  }
  0x33   : > { %186 = vxpose.xlu0.b32.start.end [1/1] (short) %v182_v0, 128  ;;  %v184_v1 = vcombine.high %v182_v0, %v182_v0 }
  0x34   : > { %s764_s9 = smov (!%p170_p9, %s537_s9), 1 }
  0x35   : > { %s407_s22 = sshll.u32 %s764_s9, 8 }
  0x36   : > { %s665_s25 = scalar_lea.vmem %s750_s1, %s407_s22 }
  0x70   : > { %218 = vxpose.xlu0.b32.start.end [1/1] (short) %v184_v1, 128 }
  0xb3   : > { %v202_v2 = vpop.trf.xlu0 }
  0xb4   : > { %251 = vst.msk [vmem:[%s665_s25] sm:$0xff] %vm250_vm0, %v202_v2 }
  0xb7   : > { %v203_v3 = vpop.trf.xlu0 }
  0xb8   : > { %252 = vst.msk [vmem:[%s665_s25 + $0x8] sm:$0xff] %vm250_vm0, %v203_v3 }
  0xbb   : > { %v204_v4 = vpop.trf.xlu0 }
  0xbc   : > { %253 = vst.msk [vmem:[%s665_s25 + $0x10] sm:$0xff] %vm250_vm0, %v204_v4 }
  0xbf   : > { %v205_v5 = vpop.trf.xlu0 }
  0xc0   : > { %254 = vst.msk [vmem:[%s665_s25 + $0x18] sm:$0xff] %vm250_vm0, %v205_v5 }
  0xc3   : > { %v206_v6 = vpop.trf.xlu0 }
  0xc4   : > { %255 = vst.msk [vmem:[%s665_s25 + $0x20] sm:$0xff] %vm250_vm0, %v206_v6 }
  0xc7   : > { %v207_v7 = vpop.trf.xlu0 }
  0xc8   : > { %256 = vst.msk [vmem:[%s665_s25 + $0x28] sm:$0xff] %vm250_vm0, %v207_v7 }
  0xcb   : > { %v208_v8 = vpop.trf.xlu0 }
  0xcc   : > { %257 = vst.msk [vmem:[%s665_s25 + $0x30] sm:$0xff] %vm250_vm0, %v208_v8 }
  0xcf   : > { %v209_v9 = vpop.trf.xlu0 }
  0xd0   : > { %258 = vst.msk [vmem:[%s665_s25 + $0x38] sm:$0xff] %vm250_vm0, %v209_v9 }
  0xd3   : > { %v210_v10 = vpop.trf.xlu0 }
  0xd4   : > { %259 = vst.msk [vmem:[%s665_s25 + $0x40] sm:$0xff] %vm250_vm0, %v210_v10 }
  0xd7   : > { %v211_v11 = vpop.trf.xlu0 }
  0xd8   : > { %260 = vst.msk [vmem:[%s665_s25 + $0x48] sm:$0xff] %vm250_vm0, %v211_v11 }
  0xdb   : > { %v212_v12 = vpop.trf.xlu0 }
  0xdc   : > { %261 = vst.msk [vmem:[%s665_s25 + $0x50] sm:$0xff] %vm250_vm0, %v212_v12 }
  0xdf   : > { %v213_v13 = vpop.trf.xlu0 }
  0xe0   : > { %262 = vst.msk [vmem:[%s665_s25 + $0x58] sm:$0xff] %vm250_vm0, %v213_v13 }
  0xe3   : > { %v214_v14 = vpop.trf.xlu0 }
  0xe4   : > { %263 = vst.msk [vmem:[%s665_s25 + $0x60] sm:$0xff] %vm250_vm0, %v214_v14 }
  0xe7   : > { %v215_v15 = vpop.trf.xlu0 }
  0xe8   : > { %264 = vst.msk [vmem:[%s665_s25 + $0x68] sm:$0xff] %vm250_vm0, %v215_v15 }
  0xeb   : > { %v216_v16 = vpop.trf.xlu0 }
  0xec   : > { %265 = vst.msk [vmem:[%s665_s25 + $0x70] sm:$0xff] %vm250_vm0, %v216_v16 }
  0xef   : > { %v217_v17 = vpop.trf.xlu0 }
  0xf0   : > { %266 = vst.msk [vmem:[%s665_s25 + $0x78] sm:$0xff] %vm250_vm0, %v217_v17 }
  0xf3   : > { %v234_v18 = vpop.trf.xlu0 }
  0xf4   : > { %267 = vst.msk [vmem:[%s665_s25 + $0x80] sm:$0xff] %vm250_vm0, %v234_v18 }
  0xf7   : > { %v235_v19 = vpop.trf.xlu0 }
  0xf8   : > { %268 = vst.msk [vmem:[%s665_s25 + $0x88] sm:$0xff] %vm250_vm0, %v235_v19 }
  0xfb   : > { %v236_v20 = vpop.trf.xlu0 }
  0xfc   : > { %269 = vst.msk [vmem:[%s665_s25 + $0x90] sm:$0xff] %vm250_vm0, %v236_v20 }
  0xff   : > { %v237_v21 = vpop.trf.xlu0 }
 0x100   : > { %270 = vst.msk [vmem:[%s665_s25 + $0x98] sm:$0xff] %vm250_vm0, %v237_v21 }
 0x103   : > { %v238_v22 = vpop.trf.xlu0 }
 0x104   : > { %271 = vst.msk [vmem:[%s665_s25 + $0xa0] sm:$0xff] %vm250_vm0, %v238_v22 }
 0x107   : > { %v239_v23 = vpop.trf.xlu0 }
 0x108   : > { %272 = vst.msk [vmem:[%s665_s25 + $0xa8] sm:$0xff] %vm250_vm0, %v239_v23 }
 0x10b   : > { %v240_v24 = vpop.trf.xlu0 }
 0x10c   : > { %273 = vst.msk [vmem:[%s665_s25 + $0xb0] sm:$0xff] %vm250_vm0, %v240_v24 }
 0x10f   : > { %v241_v25 = vpop.trf.xlu0 }
 0x110   : > { %274 = vst.msk [vmem:[%s665_s25 + $0xb8] sm:$0xff] %vm250_vm0, %v241_v25 }
 0x113   : > { %v242_v26 = vpop.trf.xlu0 }
 0x114   : > { %275 = vst.msk [vmem:[%s665_s25 + $0xc0] sm:$0xff] %vm250_vm0, %v242_v26 }
 0x117   : > { %v243_v27 = vpop.trf.xlu0 }
 0x118   : > { %276 = vst.msk [vmem:[%s665_s25 + $0xc8] sm:$0xff] %vm250_vm0, %v243_v27 }
 0x11b   : > { %v244_v28 = vpop.trf.xlu0 }
 0x11c   : > { %277 = vst.msk [vmem:[%s665_s25 + $0xd0] sm:$0xff] %vm250_vm0, %v244_v28 }
 0x11f   : > { %v245_v29 = vpop.trf.xlu0 }
 0x120   : > { %278 = vst.msk [vmem:[%s665_s25 + $0xd8] sm:$0xff] %vm250_vm0, %v245_v29 }
 0x123   : > { %v246_v30 = vpop.trf.xlu0 }
 0x124   : > { %279 = vst.msk [vmem:[%s665_s25 + $0xe0] sm:$0xff] %vm250_vm0, %v246_v30 }
 0x127   : > { %v247_v31 = vpop.trf.xlu0 }
 0x128   : > { %280 = vst.msk [vmem:[%s665_s25 + $0xe8] sm:$0xff] %vm250_vm0, %v247_v31 }
 0x12b   : > { %v248_v32 = vpop.trf.xlu0 }
 0x12c   : > { %281 = vst.msk [vmem:[%s665_s25 + $0xf0] sm:$0xff] %vm250_vm0, %v248_v32 }
 0x12f   : > { %v249_v33 = vpop.trf.xlu0 }
 0x130   : > { %282 = vst.msk [vmem:[%s665_s25 + $0xf8] sm:$0xff] %vm250_vm0, %v249_v33 }
 0x131 PF: > { %s14_s11 = sadd.s32 1, %s545_s11   ;;  %s756_s6 = smov %s529_s7 }
 0x132   : > { %p11_p7 = scmp.ge.s32.totalorder %s14_s11, 4   ;;  %s757_s7 = smov %s533_s8 }
 0x133   : > { %s758_s8 = smov %s607_s18  ;;  %s759_s9 = smov %s541_s10 }
 0x134   : > { %s760_s10 = smov %s762_s13  ;;  %13 = sbr.rel (!%p11_p7) target bundleno = 4 (0x4), region = 64 }
 0x13b   :  { %319 = vsyncpa [#allocation3], 1 }
 0x13c   :  { %321 = vsyncpa [#allocation3 + $0x1], 1 }

</bundles_post_ra>
